<compile_context>
chip_gen: v7x
topology: tpu7x:2x2x1
jax: 0.10.0
libtpu: 0.0.40
codegen_flags: <defaults>
</compile_context>

<pallas_src>
import jax
import jax.numpy as jnp
from jax.experimental import pallas as pl
from jax.experimental.pallas import tpu as pltpu


def soft_attention_kernel(x_ref, h_ref,
                          w_enc_ref, b_enc_ref,
                          w_dec_ref, b_dec_ref,
                          w_full_ref, b_full_ref,
                          w_beta_ref, b_beta_ref,
                          out_ref, alpha_ref):
    TB, L, E = x_ref.shape
    A = w_enc_ref.shape[1]

    x = x_ref[...]                                   # (TB, L, E)
    h = h_ref[...]                                   # (TB, D)

    # encoder_att over the whole batch block: one (TB*L, E) @ (E, A) MXU pass.
    x2 = x.reshape(TB * L, E)
    att1 = jnp.dot(x2, w_enc_ref[...],
                   preferred_element_type=jnp.float32) + b_enc_ref[...]     # (TB*L, A)
    att1 = att1.reshape(TB, L, A)

    # decoder_att for the whole block in one batched matmul.
    att2 = jnp.dot(h, w_dec_ref[...],
                   preferred_element_type=jnp.float32) + b_dec_ref[...]     # (TB, A)

    e = jnp.maximum(att1 + att2[:, None, :], 0.0)                           # (TB, L, A)

    # full_att as VPU multiply + lane reduction (avoids an M=1 MXU pass).
    # b_full is constant across scores (cancels in softmax) but kept for fidelity.
    scores = jnp.sum(e * w_full_ref[...], axis=-1) + b_full_ref[0, 0]       # (TB, L)

    # softmax over L; reciprocal seeded on the EUP + 1 Newton step -> ~f32 accuracy.
    m = jnp.max(scores, axis=-1, keepdims=True)                             # (TB, 1)
    p = jnp.exp(scores - m)                                                 # (TB, L)
    denom = jnp.sum(p, axis=-1, keepdims=True)                              # (TB, 1)
    r = pl.reciprocal(denom, approx=True)
    r = r * (2.0 - denom * r)                                               # Newton refine
    alpha = p * r                                                           # (TB, L)

    # z = sum_L alpha * x : broadcast-multiply + sublane reduction (MXU stays free).
    z = jnp.sum(alpha[:, :, None] * x, axis=1)                              # (TB, E)

    # gate = sigmoid(h @ Wb + bb) for the whole block (Wb pre-transposed to (D, 1)).
    gate = jax.nn.sigmoid(
        jnp.dot(h, w_beta_ref[...], preferred_element_type=jnp.float32)
        + b_beta_ref[0, 0])                                                 # (TB, 1)

    out_ref[...] = (gate * z).astype(out_ref.dtype)                         # (TB, E)
    alpha_ref[...] = alpha.astype(alpha_ref.dtype)                          # (TB, L)


def soft_attention(x, h, params, *, block_b=8):
    """x: (B, L, E) f32, h: (B, D) f32 -> (gated_z: (B, E), alpha: (B, L))."""
    B, L, E = x.shape
    D = h.shape[1]
    A = params["w_enc"].shape[1]

    # Pad batch to a multiple of block_b (block_b is a multiple of 8 -> sublane-clean).
    Bp = ((B + block_b - 1) // block_b) * block_b
    if Bp != B:
        x = jnp.pad(x, ((0, Bp - B), (0, 0), (0, 0)))
        h = jnp.pad(h, ((0, Bp - B), (0, 0)))

    smem_scalar = pl.BlockSpec(memory_space=pltpu.MemorySpace.SMEM)

    out, alpha = pl.pallas_call(
        soft_attention_kernel,
        out_shape=(jax.ShapeDtypeStruct((Bp, E), x.dtype),
                   jax.ShapeDtypeStruct((Bp, L), x.dtype)),
        grid=(Bp // block_b,),
        in_specs=[
            pl.BlockSpec((block_b, L, E), lambda b: (b, 0, 0)),   # x block
            pl.BlockSpec((block_b, D), lambda b: (b, 0)),         # h block
            pl.BlockSpec((E, A), lambda b: (0, 0)),               # W_enc (in, out)
            pl.BlockSpec((1, A), lambda b: (0, 0)),               # b_enc
            pl.BlockSpec((D, A), lambda b: (0, 0)),               # W_dec (in, out)
            pl.BlockSpec((1, A), lambda b: (0, 0)),               # b_dec
            pl.BlockSpec((1, A), lambda b: (0, 0)),               # w_full row
            smem_scalar,                                          # b_full scalar (SMEM)
            pl.BlockSpec((D, 1), lambda b: (0, 0)),               # w_beta column
            smem_scalar,                                          # b_beta scalar (SMEM)
        ],
        out_specs=(pl.BlockSpec((block_b, E), lambda b: (b, 0)),  # lane/sublane-dense
                   pl.BlockSpec((block_b, L), lambda b: (b, 0))),
        compiler_params=pltpu.CompilerParams(
            dimension_semantics=("parallel",),        # batch blocks shard across cores
            vmem_limit_bytes=32 * 1024 * 1024),       # explicit, v7x-safe
    )(x, h,
      params["w_enc"], params["b_enc"],
      params["w_dec"], params["b_dec"],
      params["w_full"], params["b_full"],
      params["w_beta"], params["b_beta"])

    return out[:B], alpha[:B]


def soft_attention_ref(x, h, p):
    """Pure-JAX reference matching the PyTorch module semantics."""
    att1 = x @ p["w_enc"] + p["b_enc"]                             # (B, L, A)
    att2 = h @ p["w_dec"] + p["b_dec"]                             # (B, A)
    e = jax.nn.relu(att1 + att2[:, None, :])                       # (B, L, A)
    att = jnp.einsum("bla,a->bl", e, p["w_full"][0]) + p["b_full"][0, 0]
    alpha = jax.nn.softmax(att, axis=-1)                           # (B, L)
    z = jnp.einsum("bl,ble->be", alpha, x)                         # (B, E)
    gate = jax.nn.sigmoid(h @ p["w_beta"] + p["b_beta"][0, 0])     # (B, 1)
    return gate * z, alpha


def init_params(key, encoder_dim, decoder_dim, attention_dim):
    """Deterministic synthetic params; pre-transposed to (in, out)/column form."""
    ks = jax.random.split(key, 8)
    s = 0.1
    return {
        "w_enc":  jax.random.normal(ks[0], (encoder_dim, attention_dim), jnp.float32) * s,
        "b_enc":  jax.random.normal(ks[1], (1, attention_dim), jnp.float32) * s,
        "w_dec":  jax.random.normal(ks[2], (decoder_dim, attention_dim), jnp.float32) * s,
        "b_dec":  jax.random.normal(ks[3], (1, attention_dim), jnp.float32) * s,
        "w_full": jax.random.normal(ks[4], (1, attention_dim), jnp.float32) * s,
        "b_full": jax.random.normal(ks[5], (1, 1), jnp.float32) * s,
        "w_beta": jax.random.normal(ks[6], (decoder_dim, 1), jnp.float32) * s,
        "b_beta": jax.random.normal(ks[7], (1, 1), jnp.float32) * s,
    }


if __name__ == "__main__":
    B, L = 16, 8                       # 2 batch blocks of 8 -> 2 parallel grid steps
    encoder_dim, decoder_dim, attention_dim = 32, 32, 32

    key = jax.random.PRNGKey(0)
    kx, kh, kp = jax.random.split(key, 3)
    x = jax.random.normal(kx, (B, L, encoder_dim), jnp.float32)
    h = jax.random.normal(kh, (B, decoder_dim), jnp.float32)
    params = init_params(kp, encoder_dim, decoder_dim, attention_dim)

    out, alpha = soft_attention(x, h, params, block_b=8)
    out = jax.block_until_ready(out)
    alpha = jax.block_until_ready(alpha)

    out_ref, alpha_ref = soft_attention_ref(x, h, params)
    assert out.shape == (B, encoder_dim) and alpha.shape == (B, L)
    assert jnp.allclose(out, out_ref, atol=1e-4, rtol=1e-4)
    assert jnp.allclose(alpha, alpha_ref, atol=1e-4, rtol=1e-4)

    print("KERNEL_OK")
</pallas_src>

<mosaic_0001>
module attributes {stable_mosaic.version = 11 : i64} {
  func.func @soft_attention_kernel(%arg0: i32, %arg1: memref<8x8x32xf32, #tpu.memory_space<vmem>>, %arg2: memref<8x32xf32, #tpu.memory_space<vmem>>, %arg3: memref<32x32xf32, #tpu.memory_space<vmem>>, %arg4: memref<1x32xf32, #tpu.memory_space<vmem>>, %arg5: memref<32x32xf32, #tpu.memory_space<vmem>>, %arg6: memref<1x32xf32, #tpu.memory_space<vmem>>, %arg7: memref<1x32xf32, #tpu.memory_space<vmem>>, %arg8: memref<1x1xf32, #tpu.memory_space<smem>>, %arg9: memref<32x1xf32, #tpu.memory_space<vmem>>, %arg10: memref<1x1xf32, #tpu.memory_space<smem>>, %arg11: memref<8x32xf32, #tpu.memory_space<vmem>>, %arg12: memref<8x8xf32, #tpu.memory_space<vmem>>) attributes {dimension_semantics = [#tpu.dimension_semantics<parallel>], iteration_bounds = array<i64: 2>, scalar_prefetch = 0 : i64, scratch_operands = 0 : i64, tpu.core_type = #tpu.core_type<tc>, window_params = [{transform_indices = @transform_0, window_bounds = array<i64: 8, 8, 32>}, {transform_indices = @transform_1, window_bounds = array<i64: 8, 32>}, {pipeline_mode = #tpu.pipeline_mode<synchronous>, transform_indices = @transform_2, window_bounds = array<i64: 32, 32>}, {pipeline_mode = #tpu.pipeline_mode<synchronous>, transform_indices = @transform_3, window_bounds = array<i64: 1, 32>}, {pipeline_mode = #tpu.pipeline_mode<synchronous>, transform_indices = @transform_4, window_bounds = array<i64: 32, 32>}, {pipeline_mode = #tpu.pipeline_mode<synchronous>, transform_indices = @transform_5, window_bounds = array<i64: 1, 32>}, {pipeline_mode = #tpu.pipeline_mode<synchronous>, transform_indices = @transform_6, window_bounds = array<i64: 1, 32>}, {transform_indices = @transform_7, window_bounds = array<i64: 1, 1>}, {pipeline_mode = #tpu.pipeline_mode<synchronous>, transform_indices = @transform_8, window_bounds = array<i64: 32, 1>}, {transform_indices = @transform_9, window_bounds = array<i64: 1, 1>}, {transform_indices = @transform_10, window_bounds = array<i64: 8, 32>}, {transform_indices = @transform_11, window_bounds = array<i64: 8, 8>}]} {
    %c0 = arith.constant 0 : index
    %c0_0 = arith.constant 0 : index
    %c0_1 = arith.constant 0 : index
    %0 = vector.load %arg1[%c0, %c0_0, %c0_1] : memref<8x8x32xf32, #tpu.memory_space<vmem>>, vector<8x8x32xf32>
    %c0_2 = arith.constant 0 : index
    %c0_3 = arith.constant 0 : index
    %1 = vector.load %arg2[%c0_2, %c0_3] : memref<8x32xf32, #tpu.memory_space<vmem>>, vector<8x32xf32>
    %2 = vector.shape_cast %0 : vector<8x8x32xf32> to vector<64x32xf32>
    %c0_4 = arith.constant 0 : index
    %c0_5 = arith.constant 0 : index
    %3 = vector.load %arg3[%c0_4, %c0_5] : memref<32x32xf32, #tpu.memory_space<vmem>>, vector<32x32xf32>
    %cst = arith.constant dense<0.000000e+00> : vector<64x32xf32>
    %4 = tpu.matmul %2, %3, %cst {dimension_numbers = #tpu.dot_dimension_numbers<[1], [0], [0], [1], [0, 0, 1, 1], [], []>} : vector<64x32xf32>, vector<32x32xf32>, vector<64x32xf32> -> vector<64x32xf32>
    %c0_6 = arith.constant 0 : index
    %c0_7 = arith.constant 0 : index
    %5 = vector.load %arg4[%c0_6, %c0_7] : memref<1x32xf32, #tpu.memory_space<vmem>>, vector<1x32xf32>
    %6 = vector.broadcast %5 : vector<1x32xf32> to vector<64x32xf32>
    %7 = arith.addf %4, %6 : vector<64x32xf32>
    %8 = vector.shape_cast %7 : vector<64x32xf32> to vector<8x8x32xf32>
    %c0_8 = arith.constant 0 : index
    %c0_9 = arith.constant 0 : index
    %9 = vector.load %arg5[%c0_8, %c0_9] : memref<32x32xf32, #tpu.memory_space<vmem>>, vector<32x32xf32>
    %cst_10 = arith.constant dense<0.000000e+00> : vector<8x32xf32>
    %10 = tpu.matmul %1, %9, %cst_10 {dimension_numbers = #tpu.dot_dimension_numbers<[1], [0], [0], [1], [0, 0, 1, 1], [], []>} : vector<8x32xf32>, vector<32x32xf32>, vector<8x32xf32> -> vector<8x32xf32>
    %c0_11 = arith.constant 0 : index
    %c0_12 = arith.constant 0 : index
    %11 = vector.load %arg6[%c0_11, %c0_12] : memref<1x32xf32, #tpu.memory_space<vmem>>, vector<1x32xf32>
    %12 = vector.broadcast %11 : vector<1x32xf32> to vector<8x32xf32>
    %13 = arith.addf %10, %12 : vector<8x32xf32>
    %14 = vector.shape_cast %13 : vector<8x32xf32> to vector<8x1x32xf32>
    %15 = vector.broadcast %14 : vector<8x1x32xf32> to vector<8x8x32xf32>
    %16 = arith.addf %8, %15 : vector<8x8x32xf32>
    %cst_13 = arith.constant 0.000000e+00 : f32
    %17 = vector.broadcast %cst_13 : f32 to vector<8x8x32xf32>
    %18 = arith.maximumf %16, %17 : vector<8x8x32xf32>
    %c0_14 = arith.constant 0 : index
    %c0_15 = arith.constant 0 : index
    %19 = vector.load %arg7[%c0_14, %c0_15] : memref<1x32xf32, #tpu.memory_space<vmem>>, vector<1x32xf32>
    %20 = vector.shape_cast %19 : vector<1x32xf32> to vector<1x1x32xf32>
    %21 = vector.broadcast %20 : vector<1x1x32xf32> to vector<8x8x32xf32>
    %22 = arith.mulf %18, %21 : vector<8x8x32xf32>
    %cst_16 = arith.constant dense<0.000000e+00> : vector<8x8xf32>
    %23 = vector.multi_reduction <add>, %22, %cst_16 [2] : vector<8x8x32xf32> to vector<8x8xf32>
    %c0_17 = arith.constant 0 : index
    %c0_18 = arith.constant 0 : index
    %24 = memref.load %arg8[%c0_17, %c0_18] : memref<1x1xf32, #tpu.memory_space<smem>>
    %25 = vector.broadcast %24 : f32 to vector<8x8xf32>
    %26 = arith.addf %23, %25 : vector<8x8xf32>
    %cst_19 = arith.constant dense<0xFF800000> : vector<8xf32>
    %27 = vector.multi_reduction <maximumf>, %26, %cst_19 [1] : vector<8x8xf32> to vector<8xf32>
    %28 = vector.shape_cast %27 : vector<8xf32> to vector<8x1xf32>
    %29 = vector.broadcast %28 : vector<8x1xf32> to vector<8x8xf32>
    %30 = arith.subf %26, %29 : vector<8x8xf32>
    %31 = math.exp %30 : vector<8x8xf32>
    %cst_20 = arith.constant dense<0.000000e+00> : vector<8xf32>
    %32 = vector.multi_reduction <add>, %31, %cst_20 [1] : vector<8x8xf32> to vector<8xf32>
    %33 = vector.shape_cast %32 : vector<8xf32> to vector<8x1xf32>
    %34 = tpu.reciprocal %33 {approx = true} : vector<8x1xf32> -> vector<8x1xf32>
    %35 = arith.mulf %33, %34 : vector<8x1xf32>
    %cst_21 = arith.constant 2.000000e+00 : f32
    %36 = vector.broadcast %cst_21 : f32 to vector<8x1xf32>
    %37 = arith.subf %36, %35 : vector<8x1xf32>
    %38 = arith.mulf %34, %37 : vector<8x1xf32>
    %39 = vector.broadcast %38 : vector<8x1xf32> to vector<8x8xf32>
    %40 = arith.mulf %31, %39 : vector<8x8xf32>
    %41 = vector.shape_cast %40 : vector<8x8xf32> to vector<8x8x1xf32>
    %42 = vector.broadcast %41 : vector<8x8x1xf32> to vector<8x8x32xf32>
    %43 = arith.mulf %42, %0 : vector<8x8x32xf32>
    %cst_22 = arith.constant dense<0.000000e+00> : vector<8x32xf32>
    %44 = vector.multi_reduction <add>, %43, %cst_22 [1] : vector<8x8x32xf32> to vector<8x32xf32>
    %c0_23 = arith.constant 0 : index
    %c0_24 = arith.constant 0 : index
    %45 = vector.load %arg9[%c0_23, %c0_24] : memref<32x1xf32, #tpu.memory_space<vmem>>, vector<32x1xf32>
    %cst_25 = arith.constant dense<0.000000e+00> : vector<8x1xf32>
    %46 = tpu.matmul %1, %45, %cst_25 {dimension_numbers = #tpu.dot_dimension_numbers<[1], [0], [0], [1], [0, 0, 1, 1], [], []>} : vector<8x32xf32>, vector<32x1xf32>, vector<8x1xf32> -> vector<8x1xf32>
    %c0_26 = arith.constant 0 : index
    %c0_27 = arith.constant 0 : index
    %47 = memref.load %arg10[%c0_26, %c0_27] : memref<1x1xf32, #tpu.memory_space<smem>>
    %48 = vector.broadcast %47 : f32 to vector<8x1xf32>
    %49 = arith.addf %46, %48 : vector<8x1xf32>
    %50 = arith.negf %49 : vector<8x1xf32>
    %51 = math.exp %50 : vector<8x1xf32>
    %cst_28 = arith.constant 1.000000e+00 : f32
    %52 = vector.broadcast %cst_28 : f32 to vector<8x1xf32>
    %53 = arith.addf %52, %51 : vector<8x1xf32>
    %54 = arith.divf %52, %53 : vector<8x1xf32>
    %55 = vector.broadcast %54 : vector<8x1xf32> to vector<8x32xf32>
    %56 = arith.mulf %55, %44 : vector<8x32xf32>
    %c0_29 = arith.constant 0 : index
    %c0_30 = arith.constant 0 : index
    %57 = vector.load %arg11[%c0_29, %c0_30] : memref<8x32xf32, #tpu.memory_space<vmem>>, vector<8x32xf32>
    tpu.vector_store %arg11[%c0_29, %c0_30], %56 {strides = array<i32>} : memref<8x32xf32, #tpu.memory_space<vmem>>, vector<8x32xf32>,
    %c0_31 = arith.constant 0 : index
    %c0_32 = arith.constant 0 : index
    %58 = vector.load %arg12[%c0_31, %c0_32] : memref<8x8xf32, #tpu.memory_space<vmem>>, vector<8x8xf32>
    tpu.vector_store %arg12[%c0_31, %c0_32], %40 {strides = array<i32>} : memref<8x8xf32, #tpu.memory_space<vmem>>, vector<8x8xf32>,
    return
  }
  func.func @transform_0(%arg0: i32) -> (i32, i32, i32) {
    %c0_i32 = arith.constant 0 : i32
    %c0_i32_0 = arith.constant 0 : i32
    %c0_i32_1 = arith.constant 0 : i32
    return %arg0, %c0_i32, %c0_i32_0 : i32, i32, i32
  }
  func.func @transform_1(%arg0: i32) -> (i32, i32) {
    %c0_i32 = arith.constant 0 : i32
    %c0_i32_0 = arith.constant 0 : i32
    return %arg0, %c0_i32 : i32, i32
  }
  func.func @transform_2(%arg0: i32) -> (i32, i32) {
    %c0_i32 = arith.constant 0 : i32
    %c0_i32_0 = arith.constant 0 : i32
    %c0_i32_1 = arith.constant 0 : i32
    return %c0_i32, %c0_i32_0 : i32, i32
  }
  func.func @transform_3(%arg0: i32) -> (i32, i32) {
    %c0_i32 = arith.constant 0 : i32
    %c0_i32_0 = arith.constant 0 : i32
    %c0_i32_1 = arith.constant 0 : i32
    return %c0_i32, %c0_i32_0 : i32, i32
  }
  func.func @transform_4(%arg0: i32) -> (i32, i32) {
    %c0_i32 = arith.constant 0 : i32
    %c0_i32_0 = arith.constant 0 : i32
    %c0_i32_1 = arith.constant 0 : i32
    return %c0_i32, %c0_i32_0 : i32, i32
  }
  func.func @transform_5(%arg0: i32) -> (i32, i32) {
    %c0_i32 = arith.constant 0 : i32
    %c0_i32_0 = arith.constant 0 : i32
    %c0_i32_1 = arith.constant 0 : i32
    return %c0_i32, %c0_i32_0 : i32, i32
  }
  func.func @transform_6(%arg0: i32) -> (i32, i32) {
    %c0_i32 = arith.constant 0 : i32
    %c0_i32_0 = arith.constant 0 : i32
    %c0_i32_1 = arith.constant 0 : i32
    return %c0_i32, %c0_i32_0 : i32, i32
  }
  func.func @transform_7(%arg0: i32) -> (i32, i32) {
    %c0_i32 = arith.constant 0 : i32
    %c0_i32_0 = arith.constant 0 : i32
    %c0_i32_1 = arith.constant 0 : i32
    return %c0_i32, %c0_i32_0 : i32, i32
  }
  func.func @transform_8(%arg0: i32) -> (i32, i32) {
    %c0_i32 = arith.constant 0 : i32
    %c0_i32_0 = arith.constant 0 : i32
    %c0_i32_1 = arith.constant 0 : i32
    return %c0_i32, %c0_i32_0 : i32, i32
  }
  func.func @transform_9(%arg0: i32) -> (i32, i32) {
    %c0_i32 = arith.constant 0 : i32
    %c0_i32_0 = arith.constant 0 : i32
    %c0_i32_1 = arith.constant 0 : i32
    return %c0_i32, %c0_i32_0 : i32, i32
  }
  func.func @transform_10(%arg0: i32) -> (i32, i32) {
    %c0_i32 = arith.constant 0 : i32
    %c0_i32_0 = arith.constant 0 : i32
    return %arg0, %c0_i32 : i32, i32
  }
  func.func @transform_11(%arg0: i32) -> (i32, i32) {
    %c0_i32 = arith.constant 0 : i32
    %c0_i32_0 = arith.constant 0 : i32
    return %arg0, %c0_i32 : i32, i32
  }
}

</mosaic_0001>

<bundles_post_ra>
// kernel: tpu_custom_call.1
= control target key start
LH: loop header
LB: loop body
LE: loop exit
PB: predicated region body
PF: predicated region fallthrough
CT: control target
= control target key end

     0   :  { %s2367_s0 = inlined_call_operand.hbm [shape: f32[16,8,32], index: 0, kind: input, shape index: {}]   ;;  %s2368_s1 = inlined_call_operand.vmem [shape: f32[16,32], index: 1, kind: input, shape index: {}]   ;;  %s2369_s2 = inlined_call_operand.vmem [shape: f32[32,32], index: 2, kind: input, shape index: {}]   ;;  %s2370_s3 = inlined_call_operand.vmem [shape: f32[1,32], index: 3, kind: input, shape index: {}]   ;;  %s2371_s4 = inlined_call_operand.hbm [shape: f32[32,32], index: 4, kind: input, shape index: {}]   ;;  %s2372_s5 = inlined_call_operand.vmem [shape: f32[1,32], index: 5, kind: input, shape index: {}]   ;;  %s2373_s6 = inlined_call_operand.vmem [shape: f32[1,32], index: 6, kind: input, shape index: {}]   ;;  %s2374_s7 = inlined_call_operand.<no memory space> [shape: f32[1,1], index: 7, kind: input, shape index: {}]   ;;  %s2375_s8 = inlined_call_operand.vmem [shape: f32[32,1], index: 8, kind: input, shape index: {}]   ;;  %s2376_s9 = inlined_call_operand.<no memory space> [shape: f32[1,1], index: 9, kind: input, shape index: {}]   ;;  %s2377_s10 = inlined_call_operand.hbm [shape: f32[16,32], index: 10, kind: output, shape index: {0}]   ;;  %s2378_s11 = inlined_call_operand.vmem [shape: f32[16,8], index: 11, kind: output, shape index: {1}]  }
   0x1   :  { %17 = sst [smem:[#allocation2]] %s2374_s7 }
   0x2   :  { %18 = sst [smem:[#allocation3]] %s2376_s9 }
   0x3   :  { %19 = vsyncpa [#allocation5], 0 }
   0x4   :  { %21 = vsyncpa [#allocation5 + $0x1], 0 }
   0x5   :  { %22 = vsyncpa [#allocation8], 0 }
   0x6   :  { %23 = vsyncpa [#allocation6], 0 }
   0x7   :  { %25 = vsyncpa [#allocation6 + $0x1], 0  ;;  %s1891_s21 = smov 0   ;;  %s1893_s22 = smov 0  }
   0x8   :  { %s1895_s23 = smov 0   ;;  %s1897_s24 = smov 0  }
   0x9 LB: > { %s1912_s7 = sadd.s32 4294967295, %s1813_s24   ;;  %s1481_s9 = sadd.s32 4294967294, %s1813_s24   ;;  %s1813_s24 = sphi %s1897_s24, %s2403_s24   ;;  %s1809_s23 = sphi %s1895_s23, %s2406_s23   ;;  %s1805_s22 = sphi %s1893_s22, %s2405_s22   ;;  %s1801_s21 = sphi %s1891_s21, %s2404_s21  }
   0xa   : > { %p51_p0 = scmp.ne.s32.totalorder %s1805_s22, %s1801_s21  ;;  %p2379_p1 = scmp.eq.s32.totalorder %s1912_s7, 0 }
   0xb   : > { %p275_p3 = scmp.eq.s32.totalorder %s1481_s9, 1  ;;  %p1482_p5 = scmp.ge.s32.totalorder %s1813_s24, 1 }
   0xc   : > { %p1921_p4 = por %p2379_p1, %p51_p0  ;;  %p308_p7 = scmp.lt.s32.totalorder %s1813_s24, 3 }
   0xd   : > { %p1926_p6 = por %p275_p3, %p51_p0  ;;  %s1815_s28 = smov [#allocation7]  }
   0xe   : > { %s2386_s25 = scalar_select %p1921_p4, 1, 0 }
   0xf   : > { %s2387_s26 = scalar_select %p1926_p6, 1, 0 }
  0x10   : > { %p1931_p8 = pnand %p1482_p5, %p308_p7  ;;  %s326_s29 = sshll.u32 %s1815_s28, 4  ;;  %s1935_s29 = int_to_ptr.vmem [resolvable:$true] %s326_s29 }
  0x11   : > { %2388 = sst [smem:[#allocation13_spill]] %s2387_s26  ;;  %s1947_s12 = sadd.s32 1, %s1813_s24  }
  0x12   : > { %s2389_s27 = scalar_select %p1931_p8, 1, 0 }
  0x13   : > { %p1605_p9 = pneg %p1931_p8  ;;  %2391 = sst [smem:[#allocation14_spill]] %s1947_s12 }
  0x14   : > { %s38_s13 = sadd.s32 1, %s1809_s23  ;;  %s35_s14 = ssub.s32 %s1813_s24, %s1947_s12 }
  0x15   : > { %p1942_p11 = pnand %p1605_p9, %p2379_p1  ;;  %s1685_s17 = scalar_lea.hbm %s2371_s4, 512 }
  0x16   : > { %p1686_p12 = scmp.ne.s32.totalorder %s2371_s4, %s1685_s17  ;;  %p1692_p5 = scmp.lt.u32.totalorder %s1685_s17, %s2371_s4 }
  0x17   : > { %p1687_p13 = pneg %p1942_p11 }
  0x19   : > { %p1688_p0 = pnand %p1687_p13, %p1686_p12 }
  0x1b   : > { %p1689_p3 = pneg %p1688_p0 }
  0x1d   : > { %p1694_p7 = pnand %p1692_p5, %p1689_p3 }
  0x1f   : > { %1697 = shalt.err (!%p1694_p7)
}
  0x20   : > { %s1698_s28 = scalar_lea.vmem %s1935_s29, 512  ;;  %p1706_p2 = scmp.lt.s32.totalorder %s1935_s29, %s1935_s29 }
  0x21   : > { %p1699_p9 = scmp.ne.s32.totalorder %s1935_s29, %s1698_s28  ;;  %p1707_p6 = scmp.lt.s32.totalorder %s1698_s28, %s1698_s28 }
  0x23   : > { %p1701_p10 = pnand %p1699_p9, %p1687_p13  ;;  %p1708_p4 = por %p1707_p6, %p1706_p2 }
  0x25   : > { %p1702_p1 = pneg %p1701_p10 }
  0x27   : > { %p1709_p8 = pnand %p1708_p4, %p1702_p1 }
  0x29   : > { %1712 = shalt.err (!%p1709_p8)
}
  0x2a   : > { %s2385_s15 = smov 128   ;;  %s1817_s16 = smov 8  }
  0x2b   : > { %1608 = dma.hbm_to_vmem [thread:$0]  (!%p1942_p11), %s2371_s4, 512, %s1935_s29, [#allocation8], %s2385_s15, %s2385_s15, %s1817_s16  }
  0x2c   : > { %p36_p1 = scmp.eq.s32.totalorder %s35_s14, 0  ;;  %p45_p2 = scmp.ne.s32.totalorder %s1809_s23, %s1805_s22 }
  0x2d   : > { %p46_p4 = scmp.eq.s32.totalorder %s1813_s24, 0  ;;  %p1618_p6 = scmp.lt.s32.totalorder %s1813_s24, 2 }
  0x2e   : > { %s1981_s19 = scalar_select %p36_p1, %s1809_s23, %s38_s13  }
  0x2f   : > { %p47_p8 = por %p46_p4, %p45_p2  ;;  %p2392_p10 = scmp.eq.s32.totalorder %s1912_s7, 1 }
  0x30   : > { %s355_s30 = sand.u32 1, %s1809_s23   ;;  %s1512_s9 = sshll.u32 %s1813_s24, 10 }
  0x31   : > { %p1985_p12 = por %p2392_p10, %p45_p2  ;;  %s1485_s28 = sshll.u32 %s355_s30, 6 }
  0x32   : > { %s1994_s17 = scalar_lea.hbm %s2367_s0, %s1512_s9  ;;  %s359_s29 = scalar_lea.vmem [#allocation4], %s1485_s28 }
  0x33   : > { %s366_s13 = sshll.u32 %s359_s29, 4  ;;  %p1996_p11 = pnand %p1618_p6, %p47_p8  ;;  %s2000_s13 = int_to_ptr.vmem [resolvable:$true] %s366_s13 }
  0x34   : > { %s2002_s18 = scalar_lea.sflag [#allocation5], %s355_s30  ;;  %s1713_s15 = scalar_lea.hbm %s1994_s17, 1024 }
  0x35   : > { %p1714_p13 = scmp.ne.s32.totalorder %s1994_s17, %s1713_s15  ;;  %p1715_p0 = pneg %p1996_p11 }
  0x36   : > { %s1718_s9 = scalar_lea.hbm %s2367_s0, 2048  ;;  %p1719_p7 = scmp.lt.u32.totalorder %s1994_s17, %s2367_s0 }
  0x37   : > { %p1716_p3 = pnand %p1715_p0, %p1714_p13  ;;  %p1720_p9 = scmp.lt.u32.totalorder %s1718_s9, %s1713_s15 }
  0x38   : > { %p1722_p2 = scmp.lt.u32.totalorder %s1713_s15, %s1994_s17 }
  0x39   : > { %p1717_p5 = pneg %p1716_p3  ;;  %p1721_p1 = por %p1720_p9, %p1719_p7 }
  0x3b   : > { %p1723_p4 = por %p1722_p2, %p1721_p1 }
  0x3d   : > { %p1724_p6 = pnand %p1723_p4, %p1717_p5 }
  0x3f   : > { %1727 = shalt.err (!%p1724_p6)
}
  0x40   : > { %s1728_s30 = scalar_lea.vmem %s2000_s13, 1024  ;;  %s1818_s26 = smov [#allocation4]  }
  0x41   : > { %p1729_p8 = scmp.ne.s32.totalorder %s2000_s13, %s1728_s30  ;;  %s1733_s12 = sshll.u32 %s1818_s26, 4  ;;  %s1734_s12 = int_to_ptr.vmem [resolvable:$false] %s1733_s12 }
  0x42   : > { %s1735_s28 = scalar_lea.vmem %s1734_s12, 2048  ;;  %p1736_p3 = scmp.lt.s32.totalorder %s2000_s13, %s1734_s12 }
  0x43   : > { %p1731_p10 = pnand %p1729_p8, %p1715_p0  ;;  %p1737_p7 = scmp.lt.s32.totalorder %s1735_s28, %s1728_s30 }
  0x45   : > { %p1732_p13 = pneg %p1731_p10  ;;  %p1738_p9 = por %p1737_p7, %p1736_p3 }
  0x47   : > { %p1739_p1 = pnand %p1738_p9, %p1732_p13 }
  0x49   : > { %1742 = shalt.err (!%p1739_p1)
}
  0x4a   : > { %s2395_s15 = smov 128   ;;  %p2396_p0 = scmp.ne.s32.totalorder %s2389_s27, 0 }
  0x4b   : > { %1612 = dma.hbm_to_vmem [thread:$0]  (!%p1996_p11), %s1994_s17, 1024, %s2000_s13, %s2002_s18, %s2395_s15, %s2395_s15, %s1817_s16  }
  0x4c   : > { %385 = sbr.rel (%p2396_p0) target bundleno = 1154 (0x482), region = 60  ;;  %s2036_s9 = sand.u32 (!%p2396_p0), 1, %s1805_s22  }
  0x4d   : > { %s1489_s29 = sshll.u32 (!%p2396_p0), %s2036_s9, 6  ;;  %s388_s30 = scalar_lea.sflag (!%p2396_p0), [#allocation5], %s2036_s9 }
  0x4e   : > { %s2040_s26 = scalar_lea.vmem (!%p2396_p0), [#allocation4], %s1489_s29  ;;  %p2397_p5 = scmp.ne.s32.totalorder (!%p2396_p0), %s2386_s25, 0 }
  0x53   : > { %1788 = dma.done.wait (%p2397_p5), %s388_s30, 1024  }
  0x54   : > { %1790 = vsyncadd (%p2397_p5), %s388_s30, 4294966272  ;;  %p2398_p11 = scmp.eq.s32.totalorder %s1912_s7, 0 }
  0x56   : > { %1792 = dma.done.wait (%p2398_p11), [#allocation8], 512   ;;  %p2399_p2 = pmov %p2398_p11 }
  0x57   : > { %v1819_v0 = vmov 0.0|0.0   ;;  %vm1820_vm0 = vmmov 0   ;;  %v1821_v1 = vmov 0.0   ;;  %p443_p4 = scmp.lt.s32.totalorder %s1912_s7, 1  ;;  %v460_v2 = vld [vmem:[%s2369_s2] sm:$0xff]  ;;  %v461_v3 = vld [vmem:[%s2369_s2 + $0x8] sm:$0xff]  ;;  %v690_v25 = vlaneseq }
  0x58   : > { %1794 = vsyncadd (%p2399_p2), [#allocation8], 4294966784  ;;  %1585 = vmatprep.subr.bf16.mxu1 %v1819_v0  ;;  %1563 = vmatprep.mubr.msk.f32.mxu1 %vm1820_vm0, %v1821_v1  ;;  %v601_v4 = vld [vmem:[#allocation7] sm:$0xff]  ;;  %vm471_vm1 = vcmask 261120   ;;  %v1577_v5 = vpack.c.bf16 %v461_v3, %v460_v2  ;;  %v602_v6 = vld [vmem:[#allocation7 + $0x8] sm:$0xff]  ;;  %s830_s13 = sld [smem:[#allocation2]] }
  0x59   : > { %s2054_s27 = scalar_select %p443_p4, %s1912_s7, 1  ;;  %v462_v7 = vld [vmem:[%s2369_s2 + $0x10] sm:$0xff]  ;;  %v463_v8 = vld [vmem:[%s2369_s2 + $0x18] sm:$0xff]  ;;  %v1586_v9 = vpack.c.bf16 %v602_v6, %v601_v4  ;;  %v2069_v13 = vld [vmem:[%s2040_s26] sm:$0xff]  ;;  %v1822_v23 = vmov 1966171168  }
  0x5a   : > { %v1581_v10 = vpack.c.bf16 %v463_v8, %v462_v7  ;;  %v603_v11 = vld [vmem:[#allocation7 + $0x10] sm:$0xff]  ;;  %v604_v12 = vld [vmem:[#allocation7 + $0x18] sm:$0xff]  ;;  %1578 = vmatprep.subr.bf16.mxu0 %v1577_v5  ;;  %1543 = vmatprep.mubr.msk.f32.mxu0 %vm471_vm1, %v2069_v13  ;;  %v2083_v16 = vld [vmem:[%s2040_s26 + $0x8] sm:$0xff]  ;;  %v688_v24 = vunpack.c.l.s4 %v1822_v23  ;;  %v2122_v27 = vshrl.u32 %v690_v25, 7  ;;  %vm882_vm2 = vcmask 1041409   ;;  %s1202_s14 = sld [smem:[#allocation3]] }
  0x5b   : > { %s1492_s15 = sshll.u32 %s2054_s27, 3  ;;  %1587 = vmatpush3.bf16.msra.mxu1 %v1586_v9  ;;  %1580 = vmatpush3.bf16.msra.mxu0 %v1577_v5  ;;  %v1589_v14 = vpack.c.bf16 %v604_v12, %v603_v11  ;;  %v2086_v17 = vld [vmem:[%s2040_s26 + $0x10] sm:$0xff]  ;;  %v2096_v18 = vld [vmem:[%s2040_s26 + $0x18] sm:$0xff]  ;;  %v2100_v19 = vld [vmem:[%s2040_s26 + $0x20] sm:$0xff]  ;;  %vm884_vm3 = vcmask 1042434   ;;  %vm886_vm4 = vcmask 1043459  }
  0x5c   : > { %1588 = vmatprep.subr.bf16.mxu1 %v1819_v0  ;;  %1582 = vmatprep.subr.bf16.mxu0 %v1581_v10  ;;  %s446_s25 = scalar_lea.vmem %s2368_s1, %s1492_s15  ;;  %v2107_v20 = vld [vmem:[%s2040_s26 + $0x28] sm:$0xff]  ;;  %v2110_v21 = vld [vmem:[%s2040_s26 + $0x30] sm:$0xff]  ;;  %v2117_v22 = vld [vmem:[%s2040_s26 + $0x38] sm:$0xff]  ;;  %v689_v26 = vunpack.c.0.s8 %v688_v24  ;;  %v2132_v38 = vsub.s32 0, %v2122_v27  ;;  %vm888_vm5 = vcmask 1044484   ;;  %vm890_vm6 = vcmask 1045509   ;;  %s450_s28 = scalar_lea.vmem %s2378_s11, %s1492_s15 }
  0x5d   : > { %v2080_v15 = vld [vmem:[%s446_s25] sm:$0xff]  ;;  %vm892_vm7 = vcmask 1046534   ;;  %vm894_vm8 = vcmask 1047559   ;;  %vm897_vm9 = vcmask 64512   ;;  %s1491_s27 = sshll.u32 %s2036_s9, 3  ;;  %s1509_s15 = sshll.u32 %s1912_s7, 7 }
  0x5e   : > { %v1503_v28 = vld [vmem:[%s2372_s5] ss:$0 sm:$0xff]  ;;  %v692_v29 = vsub.s32 %v689_v26, %v2122_v27  ;;  %s435_s29 = scalar_lea.vmem [#allocation9], %s1491_s27  ;;  %s2322_s17 = scalar_lea.hbm %s2377_s10, %s1509_s15 }
  0x5f   : > { %1590 = vmatpush3.bf16.msra.mxu1 %v1589_v14  ;;  %1584 = vmatpush3.bf16.msra.mxu0 %v1581_v10  ;;  %v1494_v37 = vld [vmem:[%s2370_s3] ss:$0 sm:$0xff]  ;;  %s1362_s30 = sshll.u32 %s435_s29, 4  ;;  %s1345_s7 = scalar_lea.sflag [#allocation6], %s2036_s9  ;;  %s2324_s30 = int_to_ptr.vmem [resolvable:$true] %s1362_s30 }
  0x60   : > { %1591 = vmatprep.subr.bf16.mxu1 %v1819_v0  ;;  %v1505_v9 = vld [vmem:[%s2373_s6] ss:$0 sm:$0xff]  ;;  %s1743_s26 = scalar_lea.vmem %s2324_s30, 128 }
  0x61   : > { %p1744_p6 = scmp.ne.s32.totalorder %s2324_s30, %s1743_s26 }
  0x62   : > { %1564 = vmatmul.mubr.msk.f32.vlgmr.msra.gmra.mrb[0].mxu1 %vm471_vm1, %v2080_v15  ;;  %1544 = vmatmul.mubr.msk.f32.vlgmr.msra.gmra.mrb[0].mxu0 %vm471_vm1, %v2083_v16 }
  0x63   : > { %1546 = vmatprep.mubr.msk.f32.mxu0 %vm471_vm1, %v2086_v17  ;;  %1574 = vmatprep.mubr.msk.f32.mxu1 %vm1820_vm0, %v1821_v1  ;;  %p1745_p8 = pnand %p1744_p6, %p1985_p12 }
  0x65   : > { %p1746_p10 = pneg %p1745_p8 }
  0x66   : > { %1547 = vmatmul.mubr.msk.f32.gmra.mrb[2].mxu0 %vm471_vm1, %v2096_v18 }
  0x67   : > { %1549 = vmatprep.mubr.msk.f32.mxu0 %vm471_vm1, %v2100_v19 }
  0x6a   : > { %1550 = vmatmul.mubr.msk.f32.gmra.mrb[4].mxu0 %vm471_vm1, %v2107_v20 }
  0x6b   : > { %1552 = vmatprep.mubr.msk.f32.mxu0 %vm471_vm1, %v2110_v21 }
  0x6e   : > { %1553 = vmatmul.mubr.msk.f32.gmra.mrb[6].mxu0 %vm471_vm1, %v2117_v22 }
 0x135   : > { %v681_v30 = vpop.f32.mrb[0].mxu1  ;;  %v1545_v31 = vpop.f32.mrb[0].mxu0 }
 0x136   : > { %v682_v32 = vadd.f32 %v1503_v28, %v681_v30  ;;  %v1565_v33 = vpop.f32.mrb[1].mxu1  ;;  %v562_v34 = vpop.f32.mrb[1].mxu0  ;;  %v568_v50 = vadd.f32 %v1545_v31, %v1494_v37 }
 0x137   : > { %v563_v44 = vadd.f32 %v1494_v37, %v562_v34 }
 0x138   : > { %v686_v35 = vcombine.high %v682_v32, %v682_v32  ;;  %v693_v36 = vrot.slane %v682_v32, %v692_v29 }
 0x139   : > { %v1548_v39 = vpop.f32.mrb[2].mxu0 }
 0x13a   : > { %v700_v40 = vrot.slane %v686_v35, %v692_v29  ;;  %v701_v41 = vcombine.high %v693_v36, %v693_v36  ;;  %v709_v42 = vrot.slane %v693_v36, %v692_v29  ;;  %v572_v43 = vpop.f32.mrb[3].mxu0  ;;  %v578_v51 = vadd.f32 %v1548_v39, %v1494_v37 }
 0x13b   : > { %v573_v45 = vadd.f32 %v1494_v37, %v572_v43 }
 0x13c   : > { %v702_v46 = vcombine.high %v700_v40, %v700_v40  ;;  %v723_v47 = vrot.slane %v701_v41, %v692_v29  ;;  %v738_v48 = vrot.slane %v709_v42, %v2132_v38  ;;  %v731_v49 = vcombine.high %v709_v42, %v709_v42 }
 0x13d   : > { %v1551_v52 = vpop.f32.mrb[4].mxu0  ;;  %v716_v53 = vrot.slane %v700_v40, %v692_v29 }
 0x13e   : > { %v742_v54 = vrot.slane %v723_v47, %v2132_v38  ;;  %v775_v55 = vadd.f32 %v738_v48, %v563_v44  ;;  %v733_v56 = vcombine.high %v723_v47, %v723_v47  ;;  %v746_v57 = vrot.slane %v731_v49, %v2132_v38  ;;  %v582_v58 = vpop.f32.mrb[5].mxu0 }
 0x13f   : > { %v588_v59 = vadd.f32 %v1551_v52, %v1494_v37  ;;  %v730_v60 = vrot.slane %v702_v46, %v692_v29  ;;  %v583_v61 = vadd.f32 %v1494_v37, %v582_v58  ;;  %v754_v62 = vrot.slane %v716_v53, %v2132_v38  ;;  %v1201_v58 = vld [vmem:[%s2375_s8 + $0x18] sm:$0xff] }
 0x140   : > { %v776_v63 = vadd.f32 %v742_v54, %v568_v50  ;;  %v783_v1 = vmax.f32 %v775_v55, 0.0  ;;  %v750_v2 = vrot.slane %v733_v56, %v2132_v38  ;;  %v777_v3 = vadd.f32 %v746_v57, %v573_v45  ;;  %v1198_v54 = vld [vmem:[%s2375_s8] sm:$0xff]  ;;  %v1199_v55 = vld [vmem:[%s2375_s8 + $0x8] sm:$0xff]  ;;  %v1200_v56 = vld [vmem:[%s2375_s8 + $0x10] sm:$0xff] }
 0x141   : > { %v758_v4 = vrot.slane %v730_v60, %v2132_v38  ;;  %v779_v5 = vadd.f32 %v754_v62, %v583_v61  ;;  %v1554_v6 = vpop.f32.mrb[6].mxu0  ;;  %v734_v7 = vcombine.high %v730_v60, %v730_v60  ;;  %v732_v8 = vcombine.high %v716_v53, %v716_v53 }
 0x142   : > { %v784_v10 = vmax.f32 %v776_v63, 0.0  ;;  %v778_v11 = vadd.f32 %v750_v2, %v578_v51  ;;  %v785_v12 = vmax.f32 %v777_v3, 0.0  ;;  %v598_v14 = vadd.f32 %v1554_v6, %v1494_v37  ;;  %v592_v23 = vpop.f32.mrb[7].mxu0 }
 0x143   : > { %v780_v24 = vadd.f32 %v758_v4, %v588_v59  ;;  %v766_v26 = vrot.slane %v734_v7, %v2132_v38  ;;  %v593_v28 = vadd.f32 %v1494_v37, %v592_v23  ;;  %v762_v30 = vrot.slane %v732_v8, %v2132_v38 }
 0x144   : > { %v786_v29 = vmax.f32 %v778_v11, 0.0  ;;  %v798_v31 = vmul.f32 %v1505_v9, %v783_v1  ;;  %v800_v32 = vmul.f32 %v1505_v9, %v785_v12  ;;  %v787_v34 = vmax.f32 %v779_v5, 0.0 }
 0x145   : > { %v788_v33 = vmax.f32 %v780_v24, 0.0  ;;  %v782_v35 = vadd.f32 %v766_v26, %v598_v14  ;;  %v799_v36 = vmul.f32 %v1505_v9, %v784_v10  ;;  %v781_v39 = vadd.f32 %v762_v30, %v593_v28 }
 0x146   : > { %v806_v40 = vsel %vm471_vm1, %v798_v31, 0.0  ;;  %v812_v41 = vsel %vm471_vm1, %v800_v32, 0.0  ;;  %v801_v42 = vmul.f32 %v1505_v9, %v786_v29  ;;  %v802_v44 = vmul.f32 %v1505_v9, %v787_v34 }
 0x147   : > { %807 = vadd.xlane.f32.xlu0 %v806_v40  ;;  %813 = vadd.xlane.f32.xlu1 %v812_v41  ;;  %v790_v43 = vmax.f32 %v782_v35, 0.0  ;;  %v789_v37 = vmax.f32 %v781_v39, 0.0  ;;  %v809_v45 = vsel %vm471_vm1, %v799_v36, 0.0  ;;  %v803_v47 = vmul.f32 %v1505_v9, %v788_v33 }
 0x148   : > { %v815_v46 = vsel %vm471_vm1, %v801_v42, 0.0  ;;  %v818_v48 = vsel %vm471_vm1, %v802_v44, 0.0  ;;  %v1592_v57 = vpack.c.bf16 %v1199_v55, %v1198_v54  ;;  %v1595_v59 = vpack.c.bf16 %v1201_v58, %v1200_v56 }
 0x149   : > { %v821_v49 = vsel %vm471_vm1, %v803_v47, 0.0  ;;  %v804_v50 = vmul.f32 %v1505_v9, %v789_v37  ;;  %v805_v51 = vmul.f32 %v1505_v9, %v790_v43  ;;  %v849_v60 = vand.u32 127, %v690_v25 }
 0x14a   : > { %1593 = vmatpush3.bf16.msra.mxu1 %v1592_v57  ;;  %v831_v61 = vstv %s830_s13  ;;  %v1823_v42 = vmov 0   ;;  %v908_v43 = vsub.s32 1, %v2122_v27  ;;  %v912_v44 = vsub.s32 2, %v2122_v27  ;;  %s1824_s13 = smov [#allocation9]  }
 0x14b   : > { %810 = vadd.xlane.f32.xlu0 %v809_v45  ;;  %816 = vadd.xlane.f32.xlu1 %v815_v46  ;;  %v824_v52 = vsel %vm471_vm1, %v804_v50, 0.0  ;;  %v827_v53 = vsel %vm471_vm1, %v805_v51, 0.0  ;;  %v2170_v1 = vsub.s32 %v849_v60, %v2122_v27  ;;  %v916_v37 = vsub.s32 3, %v2122_v27 }
 0x14c   : > { %1594 = vmatprep.subr.bf16.mxu1 %v1819_v0  ;;  %1662 = vset.pattern.permute.xlu0 %v1823_v42  ;;  %v924_v56 = vsub.s32 5, %v2122_v27  ;;  %v928_v60 = vsub.s32 6, %v2122_v27 }
 0x14d   : > { %1661 = vset.pattern.permute.xlu1 %v1823_v42 }
 0x14e   : > { %1596 = vmatpush3.bf16.msra.mxu1 %v1595_v59 }
 0x14f   : > { %819 = vadd.xlane.f32.xlu0 %v818_v48  ;;  %822 = vadd.xlane.f32.xlu1 %v821_v49  ;;  %v920_v49 = vsub.s32 4, %v2122_v27 }
 0x151   : > { %1575 = vmatmul.mubr.msk.f32.vlgmr.msra.gmra.mrb[2].mxu1 %vm471_vm1, %v2080_v15 }
 0x153   : > { %825 = vadd.xlane.f32.xlu0 %v824_v52  ;;  %828 = vadd.xlane.f32.xlu1 %v827_v53 }
 0x1d4   : > { %v808_v62 = vpop.xlane.xlu0 %807  ;;  %v814_v63 = vpop.xlane.xlu1 %813 }
 0x1d5   : > { %v832_v2 = vadd.f32 %v831_v61, %v808_v62  ;;  %v834_v3 = vadd.f32 %v831_v61, %v814_v63 }
 0x1d7   : > { %v853_v0 = vrot.slane %v832_v2, %v2170_v1  ;;  %v861_v8 = vrot.slane %v834_v3, %v2170_v1 }
 0x1d8   : > { %v811_v4 = vpop.xlane.xlu0 %810  ;;  %v817_v5 = vpop.xlane.xlu1 %816 }
 0x1d9   : > { %v833_v6 = vadd.f32 %v831_v61, %v811_v4  ;;  %v835_v7 = vadd.f32 %v831_v61, %v817_v5 }
 0x1db   : > { %v857_v15 = vrot.slane %v833_v6, %v2170_v1  ;;  %v865_v25 = vrot.slane %v835_v7, %v2170_v1 }
 0x1dc   : > { %v820_v9 = vpop.xlane.xlu0 %819  ;;  %v823_v10 = vpop.xlane.xlu1 %822 }
 0x1dd   : > { %v883_v11 = vsel %vm882_vm2, %v857_v15, %v853_v0  ;;  %v836_v12 = vadd.f32 %v831_v61, %v820_v9  ;;  %v837_v14 = vadd.f32 %v831_v61, %v823_v10 }
 0x1de   : > { %v885_v23 = vsel %vm884_vm3, %v861_v8, %v883_v11 }
 0x1df   : > { %v887_v24 = vsel %vm886_vm4, %v865_v25, %v885_v23  ;;  %v869_v26 = vrot.slane %v836_v12, %v2170_v1  ;;  %v873_v28 = vrot.slane %v837_v14, %v2170_v1 }
 0x1e0   : > { %v826_v29 = vpop.xlane.xlu0 %825  ;;  %v829_v30 = vpop.xlane.xlu1 %828 }
 0x1e1   : > { %v889_v31 = vsel %vm888_vm5, %v869_v26, %v887_v24  ;;  %v838_v32 = vadd.f32 %v831_v61, %v826_v29  ;;  %v839_v33 = vadd.f32 %v831_v61, %v829_v30 }
 0x1e2   : > { %v891_v34 = vsel %vm890_vm6, %v873_v28, %v889_v31 }
 0x1e3   : > { %v877_v35 = vrot.slane %v838_v32, %v2170_v1  ;;  %v881_v36 = vrot.slane %v839_v33, %v2170_v1 }
 0x1e5   : > { %v893_v39 = vsel %vm892_vm7, %v877_v35, %v891_v34 }
 0x1e6   : > { %v895_v40 = vsel %vm894_vm8, %v881_v36, %v893_v39 }
 0x1e7   : > { %v898_v41 = vsel %vm897_vm9, %v895_v40, -inf }
 0x1e8   : > { %899 = vmax.xlane.f32.xlu0 %v898_v41 }
 0x224   : > { %v1270_v24 = vpop.f32.mrb[2].mxu1 }
 0x225   : > { %v1576_v28 = vpop.f32.mrb[3].mxu1 }
 0x275   : > { %v900_v45 = vpop.xlane.xlu0 %899 }
 0x276   : > { %v905_v46 = vrot.slane %v900_v45, %v2132_v38  ;;  %v909_v47 = vrot.slane %v900_v45, %v908_v43  ;;  %v913_v48 = vrot.slane %v900_v45, %v912_v44  ;;  %v917_v50 = vrot.slane %v900_v45, %v916_v37 }
 0x277   : > { %v921_v57 = vrot.slane %v900_v45, %v920_v49  ;;  %v925_v61 = vrot.slane %v900_v45, %v924_v56 }
 0x278   : > { %v942_v51 = vsub.f32 %v832_v2, %v905_v46  ;;  %v943_v52 = vsub.f32 %v833_v6, %v909_v47  ;;  %v944_v53 = vsub.f32 %v834_v3, %v913_v48  ;;  %v945_v58 = vsub.f32 %v835_v7, %v917_v50 }
 0x279   : > { %v946_v62 = vsub.f32 %v836_v12, %v921_v57  ;;  %v932_v2 = vsub.s32 7, %v2122_v27  ;;  %v929_v3 = vrot.slane %v900_v45, %v928_v60  ;;  %v947_v4 = vsub.f32 %v837_v14, %v925_v61 }
 0x27a   : > { %v950_v54 = vmul.f32 1.442695, %v942_v51  ;;  %v952_v55 = vmul.f32 1.442695, %v943_v52  ;;  %v954_v59 = vmul.f32 1.442695, %v944_v53 }
 0x27b   : > { %v956_v63 = vmul.f32 1.442695, %v945_v58  ;;  %v958_v5 = vmul.f32 1.442695, %v946_v62  ;;  %v933_v0 = vrot.slane %v900_v45, %v932_v2  ;;  %v948_v15 = vsub.f32 %v838_v32, %v929_v3 }
 0x27c   : > { %1663 = vpow2.f32 %v950_v54  ;;  %v960_v25 = vmul.f32 1.442695, %v947_v4  ;;  %v1203_v32 = vstv %s1202_s14  ;;  %s1747_s14 = sshll.u32 %s1824_s13, 4  ;;  %s1748_s14 = int_to_ptr.vmem [resolvable:$false] %s1747_s14 }
 0x27d   : > { %1665 = vpow2.f32 %v952_v55  ;;  %v949_v9 = vsub.f32 %v839_v33, %v933_v0  ;;  %v962_v10 = vmul.f32 1.442695, %v948_v15  ;;  %v1271_v34 = vadd.f32 %v1270_v24, %v1203_v32  ;;  %s1749_s18 = scalar_lea.vmem %s1748_s14, 256  ;;  %p1750_p13 = scmp.lt.s32.totalorder %s2324_s30, %s1748_s14 }
 0x27e   : > { %1667 = vpow2.f32 %v954_v59  ;;  %p1751_p3 = scmp.lt.s32.totalorder %s1749_s18, %s1743_s26 }
 0x27f   : > { %1669 = vpow2.f32 %v956_v63  ;;  %v964_v12 = vmul.f32 1.442695, %v949_v9  ;;  %v1507_v36 = vmul.f32 -1.442695, %v1271_v34 }
 0x280   : > { %1671 = vpow2.f32 %v958_v5  ;;  %p1752_p7 = por %p1751_p3, %p1750_p13 }
 0x281   : > { %1673 = vpow2.f32 %v960_v25 }
 0x282   : > { %1675 = vpow2.f32 %v962_v10  ;;  %p1753_p9 = pnand %p1752_p7, %p1746_p10 }
 0x283   : > { %1677 = vpow2.f32 %v964_v12 }
 0x284   : > { %1679 = vpow2.f32 %v1507_v36 }
 0x286   : > { %v2208_v6 = vpop.eup %1663 }
 0x287   : > { %v2210_v7 = vpop.eup %1665  ;;  %975 = vperm.xlu1 %1661, %v2208_v6  }
 0x288   : > { %978 = vperm.xlu0 %1662, %v2210_v7   ;;  %v2216_v8 = vpop.eup %1667 }
 0x289   : > { %v2219_v11 = vpop.eup %1669 }
 0x28a   : > { %v2222_v14 = vpop.eup %1671 }
 0x28b   : > { %981 = vperm.xlu1 %1661, %v2216_v8   ;;  %v2225_v23 = vpop.eup %1673 }
 0x28c   : > { %v2228_v26 = vpop.eup %1675 }
 0x28d   : > { %v2231_v29 = vpop.eup %1677 }
 0x28e   : > { %v1680_v61 = vpop.eup %1679 }
 0x28f   : > { %984 = vperm.xlu1 %1661, %v2219_v11   ;;  %v1277_v4 = vadd.f32 1.0, %v1680_v61 }
 0x291   : > { %1681 = vrcp.f32 %v1277_v4 }
 0x293   : > { %987 = vperm.xlu1 %1661, %v2222_v14  }
 0x297   : > { %990 = vperm.xlu1 %1661, %v2225_v23  }
 0x29b   : > { %993 = vperm.xlu1 %1661, %v2228_v26   ;;  %v1682_v5 = vpop.eup %1681 }
 0x29f   : > { %996 = vperm.xlu1 %1661, %v2231_v29  }
 0x306   : > { %v976_v30 = vpop.permute.xlu1 %975 }
 0x307   : > { %v979_v39 = vpop.permute.xlu0 %978  ;;  %v1001_v42 = vrot.slane %v976_v30, %v2170_v1 }
 0x308   : > { %v1005_v41 = vrot.slane %v979_v39, %v2170_v1 }
 0x30a   : > { %v982_v31 = vpop.permute.xlu1 %981  ;;  %v1030_v50 = vsel %vm882_vm2, %v1005_v41, %v1001_v42 }
 0x30b   : > { %v1009_v45 = vrot.slane %v982_v31, %v2170_v1 }
 0x30d   : > { %v1031_v52 = vsel %vm884_vm3, %v1009_v45, %v1030_v50 }
 0x30e   : > { %v985_v33 = vpop.permute.xlu1 %984 }
 0x30f   : > { %v1013_v46 = vrot.slane %v985_v33, %v2170_v1 }
 0x311   : > { %v1032_v54 = vsel %vm886_vm4, %v1013_v46, %v1031_v52 }
 0x312   : > { %v988_v35 = vpop.permute.xlu1 %987 }
 0x313   : > { %v1017_v47 = vrot.slane %v988_v35, %v2170_v1 }
 0x315   : > { %v1033_v55 = vsel %vm888_vm5, %v1017_v47, %v1032_v54 }
 0x316   : > { %v991_v40 = vpop.permute.xlu1 %990 }
 0x317   : > { %v1021_v51 = vrot.slane %v991_v40, %v2170_v1 }
 0x319   : > { %v1034_v58 = vsel %vm890_vm6, %v1021_v51, %v1033_v55 }
 0x31a   : > { %v994_v48 = vpop.permute.xlu1 %993 }
 0x31b   : > { %v1025_v53 = vrot.slane %v994_v48, %v2170_v1 }
 0x31d   : > { %v1035_v62 = vsel %vm892_vm7, %v1025_v53, %v1034_v58 }
 0x31e   : > { %v997_v57 = vpop.permute.xlu1 %996 }
 0x31f   : > { %v1029_v59 = vrot.slane %v997_v57, %v2170_v1 }
 0x321   : > { %v1036_v63 = vsel %vm894_vm8, %v1029_v59, %v1035_v62 }
 0x322   : > { %v1038_v3 = vsel %vm897_vm9, %v1036_v63, 0.0 }
 0x323   : > { %1039 = vadd.xlane.f32.xlu1 %v1038_v3 }
 0x334   : > { %1282 = vperm.xlu1 %1661, %v1682_v5  }
 0x3b0   : > { %v1040_v0 = vpop.xlane.xlu1 %1039 }
 0x3b1   : > { %1683 = vrcp.f32 %v1040_v0 }
 0x3bb   : > { %v1684_v15 = vpop.eup %1683 }
 0x3bc   : > { %v1042_v25 = vmul.f32 %v1684_v15, %v1040_v0 }
 0x3be   : > { %v1043_v9 = vsub.f32 2.0, %v1042_v25 }
 0x3c0   : > { %v1044_v10 = vmul.f32 %v1684_v15, %v1043_v9 }
 0x3c2   : > { %v1049_v12 = vrot.slane %v1044_v10, %v2132_v38  ;;  %v1053_v28 = vrot.slane %v1044_v10, %v908_v43  ;;  %v1057_v31 = vrot.slane %v1044_v10, %v912_v44  ;;  %v1061_v33 = vrot.slane %v1044_v10, %v916_v37 }
 0x3c4   : > { %v1086_v24 = vmul.f32 %v2208_v6, %v1049_v12  ;;  %v1087_v30 = vmul.f32 %v2210_v7, %v1053_v28  ;;  %v1088_v32 = vmul.f32 %v2216_v8, %v1057_v31  ;;  %v1089_v38 = vmul.f32 %v2219_v11, %v1061_v33 }
 0x3c5   : > { %v1065_v6 = vrot.slane %v1044_v10, %v920_v49  ;;  %v1069_v7 = vrot.slane %v1044_v10, %v924_v56  ;;  %v1073_v8 = vrot.slane %v1044_v10, %v928_v60  ;;  %v1077_v11 = vrot.slane %v1044_v10, %v932_v2 }
 0x3c6   : > { %1096 = vperm.xlu0 %1662, %v1086_v24  }
 0x3c7   : > { %v1090_v43 = vmul.f32 %v2222_v14, %v1065_v6  ;;  %v1091_v44 = vmul.f32 %v2225_v23, %v1069_v7  ;;  %v1092_v37 = vmul.f32 %v2228_v26, %v1073_v8  ;;  %v1093_v49 = vmul.f32 %v2231_v29, %v1077_v11 }
 0x3ca   : > { %1101 = vperm.xlu0 %1662, %v1087_v30  }
 0x3ce   : > { %1106 = vperm.xlu0 %1662, %v1088_v32  }
 0x3d2   : > { %1111 = vperm.xlu0 %1662, %v1089_v38  }
 0x3d6   : > { %1116 = vperm.xlu0 %1662, %v1090_v43  }
 0x3da   : > { %1121 = vperm.xlu0 %1662, %v1091_v44  }
 0x3de   : > { %1126 = vperm.xlu0 %1662, %v1092_v37  }
 0x3e2   : > { %1131 = vperm.xlu0 %1662, %v1093_v49  }
 0x445   : > { %v1097_v14 = vpop.permute.xlu0 %1096 }
 0x446   : > { %v1134_v35 = vmul.f32 %v1097_v14, %v2069_v13  ;;  %v1306_v54 = vrot.slane %v1097_v14, %v2170_v1 }
 0x448   : > { %v1142_v26 = vsel %vm471_vm1, %v1134_v35, 0.0 }
 0x449   : > { %v1102_v34 = vpop.permute.xlu0 %1101  ;;  %v1143_v40 = vrot.slane %v1142_v26, 4 }
 0x44a   : > { %v1135_v56 = vmul.f32 %v1102_v34, %v2083_v16  ;;  %v1310_v53 = vrot.slane %v1102_v34, %v2170_v1 }
 0x44c   : > { %v1149_v60 = vsel %vm471_vm1, %v1135_v56, 0.0  ;;  %v1335_v0 = vsel %vm882_vm2, %v1310_v53, %v1306_v54 }
 0x44d   : > { %v1107_v23 = vpop.permute.xlu0 %1106  ;;  %v1150_v29 = vrot.slane %v1149_v60, 4 }
 0x44e   : > { %v1136_v36 = vmul.f32 %v1107_v23, %v2086_v17  ;;  %v1144_v17 = vadd.f32 %v1143_v40, %v1142_v26  ;;  %v1314_v57 = vrot.slane %v1107_v23, %v2170_v1 }
 0x44f   : > { %v1151_v46 = vadd.f32 %v1150_v29, %v1149_v60 }
 0x450   : > { %v1156_v27 = vsel %vm471_vm1, %v1136_v36, 0.0  ;;  %v1145_v59 = vrot.slane %v1144_v17, 2  ;;  %v1336_v10 = vsel %vm884_vm3, %v1314_v57, %v1335_v0  ;;  %v1283_v57 = vpop.permute.xlu1 %1282 }
 0x451   : > { %v1112_v2 = vpop.permute.xlu0 %1111  ;;  %v1157_v41 = vrot.slane %v1156_v27, 4  ;;  %v1152_v55 = vrot.slane %v1151_v46, 2 }
 0x452   : > { %v1137_v39 = vmul.f32 %v1112_v2, %v2096_v18  ;;  %v1318_v61 = vrot.slane %v1112_v2, %v2170_v1  ;;  %v1146_v28 = vadd.f32 %v1145_v59, %v1144_v17 }
 0x453   : > { %v1158_v47 = vadd.f32 %v1157_v41, %v1156_v27  ;;  %v1153_v9 = vadd.f32 %v1152_v55, %v1151_v46 }
 0x454   : > { %v1163_v42 = vsel %vm471_vm1, %v1137_v39, 0.0  ;;  %v1337_v31 = vsel %vm886_vm4, %v1318_v61, %v1336_v10  ;;  %v1147_v36 = vrot.slane %v1146_v28, 1 }
 0x455   : > { %v1164_v16 = vrot.slane %v1163_v42, 4  ;;  %v1117_v45 = vpop.permute.xlu0 %1116  ;;  %v1154_v11 = vrot.slane %v1153_v9, 1 }
 0x456   : > { %v1138_v13 = vmul.f32 %v1117_v45, %v2100_v19  ;;  %v1159_v19 = vrot.slane %v1158_v47, 2  ;;  %v1322_v3 = vrot.slane %v1117_v45, %v2170_v1  ;;  %v1148_v41 = vadd.f32 %v1147_v36, %v1146_v28 }
 0x457   : > { %v1165_v50 = vadd.f32 %v1164_v16, %v1163_v42  ;;  %v1155_v2 = vadd.f32 %v1154_v11, %v1153_v9 }
 0x458   : > { %v1170_v48 = vsel %vm471_vm1, %v1138_v13, 0.0  ;;  %v1160_v30 = vadd.f32 %v1159_v19, %v1158_v47  ;;  %v1338_v38 = vsel %vm888_vm5, %v1322_v3, %v1337_v31 }
 0x459   : > { %v1171_v51 = vrot.slane %v1170_v48, 4  ;;  %v1122_v52 = vpop.permute.xlu0 %1121  ;;  %v1166_v63 = vrot.slane %v1165_v50, 2  ;;  %v1293_v46 = vsel %vm882_vm2, %v1155_v2, %v1148_v41 }
 0x45a   : > { %v1139_v18 = vmul.f32 %v1122_v52, %v2107_v20  ;;  %v1326_v15 = vrot.slane %v1122_v52, %v2170_v1  ;;  %v1161_v56 = vrot.slane %v1160_v30, 1 }
 0x45b   : > { %v1172_v58 = vadd.f32 %v1171_v51, %v1170_v48  ;;  %v1167_v33 = vadd.f32 %v1166_v63, %v1165_v50 }
 0x45c   : > { %v1177_v62 = vsel %vm471_vm1, %v1139_v18, 0.0  ;;  %v1339_v44 = vsel %vm890_vm6, %v1326_v15, %v1338_v38  ;;  %v1162_v40 = vadd.f32 %v1161_v56, %v1160_v30 }
 0x45d   : > { %v1178_v4 = vrot.slane %v1177_v62, 4  ;;  %v1127_v5 = vpop.permute.xlu0 %1126  ;;  %v1173_v20 = vrot.slane %v1172_v58, 2  ;;  %v1168_v60 = vrot.slane %v1167_v33, 1 }
 0x45e   : > { %v1140_v25 = vmul.f32 %v1127_v5, %v2110_v21  ;;  %v1330_v24 = vrot.slane %v1127_v5, %v2170_v1  ;;  %v1294_v48 = vsel %vm884_vm3, %v1162_v40, %v1293_v46 }
 0x45f   : > { %v1179_v12 = vadd.f32 %v1178_v4, %v1177_v62  ;;  %v1174_v21 = vadd.f32 %v1173_v20, %v1172_v58  ;;  %v1169_v42 = vadd.f32 %v1168_v60, %v1167_v33 }
 0x460   : > { %v1184_v32 = vsel %vm471_vm1, %v1140_v25, 0.0  ;;  %v1340_v34 = vsel %vm892_vm7, %v1330_v24, %v1339_v44 }
 0x461   : > { %v1180_v6 = vrot.slane %v1179_v12, 2  ;;  %v1185_v43 = vrot.slane %v1184_v32, 4  ;;  %v1132_v7 = vpop.permute.xlu0 %1131  ;;  %v1295_v51 = vsel %vm886_vm4, %v1169_v42, %v1294_v48 }
 0x462   : > { %v1141_v8 = vmul.f32 %v1132_v7, %v2117_v22  ;;  %v1334_v37 = vrot.slane %v1132_v7, %v2170_v1  ;;  %v1175_v22 = vrot.slane %v1174_v21, 1 }
 0x463   : > { %v1181_v49 = vadd.f32 %v1180_v6, %v1179_v12  ;;  %v1186_v14 = vadd.f32 %v1185_v43, %v1184_v32 }
 0x464   : > { %v1191_v35 = vsel %vm471_vm1, %v1141_v8, 0.0  ;;  %v1341_v23 = vsel %vm894_vm8, %v1334_v37, %v1340_v34  ;;  %v1176_v13 = vadd.f32 %v1175_v22, %v1174_v21 }
 0x465   : > { %v1187_v26 = vrot.slane %v1186_v14, 2  ;;  %v1192_v27 = vrot.slane %v1191_v35, 4  ;;  %1343 = vst.msk [vmem:[%s450_s28] sm:$0xff] %vm897_vm9, %v1341_v23  ;;  %v1182_v1 = vrot.slane %v1181_v49, 1 }
 0x466   : > { %v1296_v53 = vsel %vm888_vm5, %v1176_v13, %v1295_v51 }
 0x467   : > { %v1188_v39 = vadd.f32 %v1187_v26, %v1186_v14  ;;  %v1193_v29 = vadd.f32 %v1192_v27, %v1191_v35  ;;  %v1183_v17 = vadd.f32 %v1182_v1, %v1181_v49 }
 0x469   : > { %v1189_v16 = vrot.slane %v1188_v39, 1  ;;  %v1194_v45 = vrot.slane %v1193_v29, 2  ;;  %v1297_v18 = vsel %vm890_vm6, %v1183_v17, %v1296_v53 }
 0x46b   : > { %v1195_v47 = vadd.f32 %v1194_v45, %v1193_v29  ;;  %v1190_v50 = vadd.f32 %v1189_v16, %v1188_v39 }
 0x46d   : > { %v1196_v52 = vrot.slane %v1195_v47, 1  ;;  %v1298_v55 = vsel %vm892_vm7, %v1190_v50, %v1297_v18 }
 0x46f   : > { %v1197_v54 = vadd.f32 %v1196_v52, %v1195_v47 }
 0x471   : > { %v1299_v58 = vsel %vm894_vm8, %v1197_v54, %v1298_v55 }
 0x472   : > { %v1301_v59 = vmul.f32 %v1299_v58, %v1283_v57 }
 0x474   : > { %1302 = vst.msk [vmem:[%s435_s29] sm:$0xff] %vm471_vm1, %v1301_v59 }
 0x475   : > { %1756 = shalt.err (!%p1753_p9)
}
 0x476   : > { %s1757_s9 = scalar_lea.hbm %s2322_s17, 128  ;;  %s1761_s27 = scalar_lea.hbm %s2377_s10, 256 }
 0x477   : > { %p1758_p1 = scmp.ne.s32.totalorder %s2322_s17, %s1757_s9  ;;  %p1762_p11 = scmp.lt.u32.totalorder %s2322_s17, %s2377_s10 }
 0x478   : > { %p1763_p2 = scmp.lt.u32.totalorder %s1761_s27, %s1757_s9  ;;  %p1765_p6 = scmp.lt.u32.totalorder %s1757_s9, %s2322_s17 }
 0x479   : > { %p1759_p0 = pnand %p1758_p1, %p1985_p12 }
 0x47a   : > { %p1764_p4 = por %p1763_p2, %p1762_p11 }
 0x47b   : > { %p1760_p5 = pneg %p1759_p0 }
 0x47c   : > { %p1766_p8 = por %p1765_p6, %p1764_p4 }
 0x47e   : > { %p1767_p10 = pnand %p1766_p8, %p1760_p5 }
 0x480   : > { %1770 = shalt.err (!%p1767_p10)
}
 0x481   : > { %1603 = dma.vmem_to_hbm [thread:$0]  (%p1985_p12), %s2324_s30, 128, %s2322_s17, %s1345_s7  }
 0x482 PF: > { %s2400_s25 = sld [smem:[#allocation13_spill]]  ;;  %s1377_s16 = sand.u32 1, %s1801_s21  }
 0x483   : > { %p2402_p3 = scmp.ge.s32.totalorder %s1813_s24, 2  ;;  %s1378_s26 = scalar_lea.sflag [#allocation6], %s1377_s16 }
 0x488   : > { %p2401_p13 = scmp.ne.s32.totalorder %s2400_s25, 0 }
 0x48a   : > { %p1614_p7 = pnand %p2402_p3, %p2401_p13 }
 0x48c   : > { %1796 = dma.done.wait (!%p1614_p7), %s1378_s26, 128  }
 0x48d   : > { %1798 = vsyncadd (!%p1614_p7), %s1378_s26, 4294967168  ;;  %s2403_s24 = sld [smem:[#allocation14_spill]]  ;;  %s2404_s21 = smov %s1805_s22 }
 0x48e   : > { %s2405_s22 = smov %s1809_s23  ;;  %s2406_s23 = smov %s1981_s19 }
 0x493   : > { %p28_p9 = scmp.ge.s32.totalorder %s2403_s24, 4  }
 0x495   :  { %30 = sbr.rel (!%p28_p9) target bundleno = 9 (0x9), region = 124 }
 0x49c   :  { %1390 = vsyncpa [#allocation5], 1 }
 0x49d   :  { %1392 = vsyncpa [#allocation5 + $0x1], 1 }
 0x49e   :  { %1393 = vsyncpa [#allocation8], 1 }
 0x49f   :  { %1394 = vsyncpa [#allocation6], 1 }
 0x4a0   :  { %1396 = vsyncpa [#allocation6 + $0x1], 1 }

</bundles_post_ra>
